<compile_context>
chip_gen: v7x
topology: tpu7x:2x2x1
jax: 0.10.0
libtpu: 0.0.40
codegen_flags: <defaults>
</compile_context>

<pallas_src>
import functools

import jax
import jax.numpy as jnp
from jax.experimental import pallas as pl
from jax.experimental.pallas import tpu as pltpu


def _round_up(x, m):
    return (x + m - 1) // m * m


def _pick_tile(dim, candidates):
    """Largest candidate that evenly divides `dim`, else the full dim."""
    for c in candidates:
        if dim >= c and dim % c == 0:
            return c
    return dim


def _vmem_limit(working_set_bytes):
    # Raise past the 16/32 MiB default scoped limits but stay under v7x's
    # 64 MiB physical VMEM.
    return int(min(max(working_set_bytes + (4 << 20), 32 << 20), 48 << 20))


# -----------------------------------------------------------------------------
# Kernel 1: generic (M, K) @ (K, N) + bias matmul.  Used for the hoisted input
# projection (x -> gates_x) and for the vocab projection (h -> logits).
# -----------------------------------------------------------------------------
def _matmul_bias_kernel(x_ref, w_ref, b_ref, o_ref):
    o_ref[...] = (jnp.dot(x_ref[...], w_ref[...],
                          preferred_element_type=jnp.float32)
                  + b_ref[...]).astype(o_ref.dtype)


def matmul_bias(x, w, b, out_dtype=jnp.float32):
    """x: (M, K); w: (K, N); b: (1, N) f32.  K kept whole (decoder sizes)."""
    M, K = x.shape
    N = w.shape[-1]
    tn = _pick_tile(N, (1024, 512, 256, 128))
    bx = jnp.dtype(x.dtype).itemsize
    bw = jnp.dtype(w.dtype).itemsize
    bo = jnp.dtype(out_dtype).itemsize

    def est(tm):
        # double-buffered inputs / output + bias
        return 2 * (tm * K * bx + K * tn * bw + tm * tn * bo) + N * 4

    # Full-M block when it fits comfortably: the (K, N) weight is then streamed
    # from HBM exactly once.  Otherwise fall back to lane/sublane-aligned tiles.
    tm = M if est(M) <= (20 << 20) else _pick_tile(
        M, (2048, 1024, 512, 256, 128, 64, 32, 16, 8))

    return pl.pallas_call(
        _matmul_bias_kernel,
        out_shape=jax.ShapeDtypeStruct((M, N), out_dtype),
        grid_spec=pltpu.PrefetchScalarGridSpec(
            num_scalar_prefetch=0,
            grid=(M // tm, N // tn),
            in_specs=[
                pl.BlockSpec((tm, K), lambda i, j: (i, 0)),
                pl.BlockSpec((K, tn), lambda i, j: (0, j)),
                pl.BlockSpec((1, tn), lambda i, j: (0, j)),
            ],
            out_specs=pl.BlockSpec((tm, tn), lambda i, j: (i, j)),
        ),
        compiler_params=pltpu.CompilerParams(
            dimension_semantics=("parallel", "parallel"),
            vmem_limit_bytes=_vmem_limit(est(tm))),
    )(x, w, b)


# -----------------------------------------------------------------------------
# Kernel 2: serial LSTM recurrence — single invocation, fori_loop over time.
# Only h_prev @ W_hh remains inside the loop (x-projection already hoisted).
# -----------------------------------------------------------------------------
def _lstm_recurrence_kernel(gx_ref, whh_ref, h0_ref, c0_ref,
                            hseq_ref, hN_ref, cN_ref,
                            *, seq_len, hidden_pad, compute_dtype):
    H = hidden_pad
    whh = whh_ref[...]          # (H_pad, 4*H_pad): loaded ONCE, loop-invariant

    def step(t, carry):
        h_prev, c_prev = carry                       # h: compute dtype, c: f32
        gates = gx_ref[t] + jnp.dot(h_prev, whh,
                                    preferred_element_type=jnp.float32)
        # PyTorch gate order i, f, g, o — each slice is lane-aligned (128-wide).
        # sigmoid(x) == 0.5*(1+tanh(0.5*x)): fewer EUP pushes than exp+recip.
        i_g = 0.5 * (1.0 + jnp.tanh(0.5 * gates[:, 0 * H:1 * H]))
        f_g = 0.5 * (1.0 + jnp.tanh(0.5 * gates[:, 1 * H:2 * H]))
        g_g = jnp.tanh(gates[:, 2 * H:3 * H])
        o_g = 0.5 * (1.0 + jnp.tanh(0.5 * gates[:, 3 * H:4 * H]))
        c_new = f_g * c_prev + i_g * g_g             # cell state kept in f32
        h_new = o_g * jnp.tanh(c_new)                # f32
        hseq_ref[t] = h_new.astype(hseq_ref.dtype)
        return (h_new.astype(compute_dtype), c_new)

    h_fin, c_fin = jax.lax.fori_loop(
        0, seq_len, step,
        (h0_ref[...].astype(compute_dtype), c0_ref[...]),
        unroll=2)                                    # cross-step LLO visibility
    hN_ref[...] = h_fin.astype(jnp.float32)
    cN_ref[...] = c_fin


def lstm_recurrence(gates_x, whh, h0, c0, *, out_h_dtype, compute_dtype):
    """gates_x: (T, B_pad, 4*H_pad) f32 (bias already folded in)."""
    T, Bp, G = gates_x.shape
    Hp = h0.shape[-1]
    # Batch grid: two tiles when B_pad >= 16 so v7x's 2 TCs split the batch.
    tb = Bp // 2 if (Bp >= 16 and (Bp // 2) % 8 == 0) else Bp

    kernel = functools.partial(_lstm_recurrence_kernel, seq_len=T,
                               hidden_pad=Hp, compute_dtype=compute_dtype)
    est = (2 * (T * tb * G * 4 + T * tb * Hp * jnp.dtype(out_h_dtype).itemsize)
           + 2 * Hp * G * jnp.dtype(whh.dtype).itemsize
           + 8 * tb * Hp * 4)

    return pl.pallas_call(
        kernel,
        out_shape=(
            jax.ShapeDtypeStruct((T, Bp, Hp), out_h_dtype),   # h_t for all t
            jax.ShapeDtypeStruct((Bp, Hp), jnp.float32),      # final h
            jax.ShapeDtypeStruct((Bp, Hp), jnp.float32),      # final c
        ),
        grid_spec=pltpu.PrefetchScalarGridSpec(
            num_scalar_prefetch=0,
            grid=(Bp // tb,),
            in_specs=[
                pl.BlockSpec((T, tb, G), lambda b: (0, b, 0)),
                pl.BlockSpec((Hp, G), lambda b: (0, 0)),      # weights resident
                pl.BlockSpec((tb, Hp), lambda b: (b, 0)),
                pl.BlockSpec((tb, Hp), lambda b: (b, 0)),
            ],
            out_specs=(
                pl.BlockSpec((T, tb, Hp), lambda b: (0, b, 0)),
                pl.BlockSpec((tb, Hp), lambda b: (b, 0)),
                pl.BlockSpec((tb, Hp), lambda b: (b, 0)),
            ),
        ),
        compiler_params=pltpu.CompilerParams(
            dimension_semantics=("parallel",),
            vmem_limit_bytes=_vmem_limit(est)),
    )(gates_x, whh, h0, c0)


# -----------------------------------------------------------------------------
# Module wrapper (embedding gather + concat + padding are wrapper-side glue)
# -----------------------------------------------------------------------------
class LSTMDecoderPallas:
    def __init__(self, embed_dim, hidden_dim, vocab_size, key,
                 param_dtype=jnp.bfloat16):
        self.embed_dim = embed_dim
        self.hidden_dim = hidden_dim
        self.vocab_size = vocab_size
        self.param_dtype = param_dtype
        ks = jax.random.split(key, 7)
        s = 1.0 / jnp.sqrt(hidden_dim)
        # f32 master weights (reference uses these)
        self.embedding = jax.random.normal(ks[0], (vocab_size, embed_dim),
                                           jnp.float32)
        self.w_ih = jax.random.uniform(ks[1], (4 * hidden_dim, embed_dim),
                                       jnp.float32, -s, s)
        self.w_hh = jax.random.uniform(ks[2], (4 * hidden_dim, hidden_dim),
                                       jnp.float32, -s, s)
        self.b_ih = jax.random.uniform(ks[3], (4 * hidden_dim,), jnp.float32, -s, s)
        self.b_hh = jax.random.uniform(ks[4], (4 * hidden_dim,), jnp.float32, -s, s)
        self.w_fc = jax.random.uniform(ks[5], (vocab_size, hidden_dim),
                                       jnp.float32, -s, s)
        self.b_fc = jax.random.uniform(ks[6], (vocab_size,), jnp.float32, -s, s)

        # ---- pre-padded / pre-transposed compute weights, gate-aligned layout ----
        E, H, V = embed_dim, hidden_dim, vocab_size
        Ep, Hp, Vp = _round_up(E, 128), _round_up(H, 128), _round_up(V, 128)
        self.E_pad, self.H_pad, self.V_pad = Ep, Hp, Vp

        # (E, 4H) -> (E, 4, H) -> zero-pad -> (Ep, 4*Hp): each gate block is a
        # lane-aligned 128-wide column chunk (no lane relayout in the kernel).
        wih_g = jnp.transpose(self.w_ih).reshape(E, 4, H)
        self.wih_t_pad = (jnp.zeros((Ep, 4, Hp), jnp.float32)
                          .at[:E, :, :H].set(wih_g)
                          .reshape(Ep, 4 * Hp).astype(param_dtype))

        whh_g = jnp.transpose(self.w_hh).reshape(H, 4, H)
        self.whh_t_pad = (jnp.zeros((Hp, 4, Hp), jnp.float32)
                          .at[:H, :, :H].set(whh_g)
                          .reshape(Hp, 4 * Hp).astype(param_dtype))

        b_g = (self.b_ih + self.b_hh).reshape(4, H)
        self.bias_pad = (jnp.zeros((4, Hp), jnp.float32)
                         .at[:, :H].set(b_g).reshape(1, 4 * Hp))       # f32

        wfc_t = jnp.transpose(self.w_fc)                               # (H, V)
        self.wfc_t_pad = (jnp.zeros((Hp, Vp), jnp.float32)
                          .at[:H, :V].set(wfc_t).astype(param_dtype))
        self.bfc_pad = jnp.zeros((1, Vp), jnp.float32).at[0, :V].set(self.b_fc)

    def __call__(self, features, captions, states):
        """features: (B, E) f32; captions: (B, T) int32;
        states: (h0, c0) each (1, B, H) or None.
        Returns (logits (B, 1+T, V), (hN, cN) each (1, B, H))."""
        B = features.shape[0]
        E, H, V = self.embed_dim, self.hidden_dim, self.vocab_size
        Ep, Hp, Vp = self.E_pad, self.H_pad, self.V_pad
        Bp = _round_up(B, 8)

        if states is None:
            h0 = jnp.zeros((B, H), jnp.float32)
            c0 = jnp.zeros((B, H), jnp.float32)
        else:
            h0, c0 = states[0][0], states[1][0]

        embed = self.embedding[captions]                               # (B, T, E)
        lstm_input = jnp.concatenate(
            [features[:, None, :].astype(jnp.float32), embed], axis=1)
        T_total = lstm_input.shape[1]

        # Time-major, zero-padded (padding keeps padded h/c columns exactly 0).
        x_seq = jnp.transpose(lstm_input, (1, 0, 2)).astype(self.param_dtype)
        x_pad = (jnp.zeros((T_total, Bp, Ep), self.param_dtype)
                 .at[:, :B, :E].set(x_seq))
        h0p = jnp.zeros((Bp, Hp), jnp.float32).at[:B, :H].set(h0)
        c0p = jnp.zeros((Bp, Hp), jnp.float32).at[:B, :H].set(c0)

        # 1) Hoisted, non-recurrent input projection (+ fused bias) for ALL t.
        gates_x = matmul_bias(x_pad.reshape(T_total * Bp, Ep),
                              self.wih_t_pad, self.bias_pad,
                              out_dtype=jnp.float32)
        gates_x = gates_x.reshape(T_total, Bp, 4 * Hp)

        # 2) Serial recurrence: only h_prev @ W_hh inside the time loop.
        h_seq, hN, cN = lstm_recurrence(gates_x, self.whh_t_pad, h0p, c0p,
                                        out_h_dtype=self.param_dtype,
                                        compute_dtype=self.param_dtype)

        # 3) Deferred vocab projection (lane-dense output tiles, W_fc streamed once).
        logits_flat = matmul_bias(h_seq.reshape(T_total * Bp, Hp),
                                  self.wfc_t_pad, self.bfc_pad,
                                  out_dtype=jnp.float32)

        # Slice BEFORE transposing: shrinks the relayout by (Bp/B)*(Vp/V).
        logits = logits_flat.reshape(T_total, Bp, Vp)[:, :B, :V]
        logits = jnp.transpose(logits, (1, 0, 2))                      # (B, T, V)
        return logits, (hN[:B, :H][None], cN[:B, :H][None])


# -----------------------------------------------------------------------------
# Pure-JAX reference for self-check (f32 master weights)
# -----------------------------------------------------------------------------
def _reference(model, features, captions, states):
    B = features.shape[0]
    H = model.hidden_dim
    if states is None:
        h = jnp.zeros((B, H), jnp.float32)
        c = jnp.zeros((B, H), jnp.float32)
    else:
        h, c = states[0][0], states[1][0]
    embed = model.embedding[captions]
    x = jnp.concatenate([features[:, None, :], embed], axis=1)
    outs = []
    for t in range(x.shape[1]):
        g = (x[:, t] @ model.w_ih.T + model.b_ih
             + h @ model.w_hh.T + model.b_hh)
        i = jax.nn.sigmoid(g[:, 0 * H:1 * H])
        f = jax.nn.sigmoid(g[:, 1 * H:2 * H])
        gg = jnp.tanh(g[:, 2 * H:3 * H])
        o = jax.nn.sigmoid(g[:, 3 * H:4 * H])
        c = f * c + i * gg
        h = o * jnp.tanh(c)
        outs.append(h)
    out = jnp.stack(outs, axis=1)
    logits = out @ model.w_fc.T + model.b_fc
    return logits, (h[None], c[None])


if __name__ == "__main__":
    B, E, H, V, T = 2, 16, 32, 48, 8

    key = jax.random.PRNGKey(0)
    k_feat, k_cap, k_h, k_c, k_params = jax.random.split(key, 5)

    features = jax.random.normal(k_feat, (B, E), jnp.float32)
    captions = jax.random.randint(k_cap, (B, T), 0, V).astype(jnp.int32)
    h0 = jax.random.normal(k_h, (1, B, H), jnp.float32)
    c0 = jax.random.normal(k_c, (1, B, H), jnp.float32)
    states = (h0, c0)

    # --- bf16 compute path (production default), relaxed tolerance ---
    model = LSTMDecoderPallas(E, H, V, k_params, param_dtype=jnp.bfloat16)

    logits, (hN, cN) = model(features, captions, states)
    logits = jax.block_until_ready(logits)
    hN = jax.block_until_ready(hN)
    cN = jax.block_until_ready(cN)

    ref_logits, (ref_h, ref_c) = _reference(model, features, captions, states)
    assert logits.shape == (B, T + 1, V)
    assert hN.shape == (1, B, H) and cN.shape == (1, B, H)
    assert jnp.allclose(logits, ref_logits, atol=5e-2, rtol=5e-2)
    assert jnp.allclose(hN, ref_h, atol=5e-2, rtol=5e-2)
    assert jnp.allclose(cN, ref_c, atol=5e-2, rtol=5e-2)

    # states=None (zero initial state), as in generate()
    logits0, (hN0, cN0) = model(features, captions, None)
    logits0 = jax.block_until_ready(logits0)
    ref_logits0, (ref_h0, ref_c0) = _reference(model, features, captions, None)
    assert jnp.allclose(logits0, ref_logits0, atol=5e-2, rtol=5e-2)
    assert jnp.allclose(hN0, ref_h0, atol=5e-2, rtol=5e-2)
    assert jnp.allclose(cN0, ref_c0, atol=5e-2, rtol=5e-2)

    # --- f32 compute path: exact-semantics check at tight tolerance ---
    model32 = LSTMDecoderPallas(E, H, V, k_params, param_dtype=jnp.float32)
    logits32, (hN32, cN32) = model32(features, captions, states)
    logits32 = jax.block_until_ready(logits32)
    ref_logits32, (ref_h32, ref_c32) = _reference(model32, features, captions,
                                                  states)
    assert jnp.allclose(logits32, ref_logits32, atol=1e-4, rtol=1e-4)
    assert jnp.allclose(hN32, ref_h32, atol=1e-4, rtol=1e-4)
    assert jnp.allclose(cN32, ref_c32, atol=1e-4, rtol=1e-4)

    print("KERNEL_OK")
</pallas_src>

<mosaic_0001>
module attributes {stable_mosaic.version = 11 : i64} {
  func.func @_matmul_bias_kernel(%arg0: i32, %arg1: i32, %arg2: memref<72x128xbf16, #tpu.memory_space<vmem>>, %arg3: memref<128x512xbf16, #tpu.memory_space<vmem>>, %arg4: memref<1x512xf32, #tpu.memory_space<vmem>>, %arg5: memref<72x512xf32, #tpu.memory_space<vmem>>) attributes {dimension_semantics = [#tpu.dimension_semantics<parallel>, #tpu.dimension_semantics<parallel>], iteration_bounds = array<i64: 1, 1>, scalar_prefetch = 0 : i64, scratch_operands = 0 : i64, tpu.core_type = #tpu.core_type<tc>, window_params = [{transform_indices = @transform_0, window_bounds = array<i64: 72, 128>}, {transform_indices = @transform_1, window_bounds = array<i64: 128, 512>}, {transform_indices = @transform_2, window_bounds = array<i64: 1, 512>}, {transform_indices = @transform_3, window_bounds = array<i64: 72, 512>}]} {
    %c0 = arith.constant 0 : index
    %c0_0 = arith.constant 0 : index
    %0 = vector.load %arg2[%c0, %c0_0] : memref<72x128xbf16, #tpu.memory_space<vmem>>, vector<72x128xbf16>
    %c0_1 = arith.constant 0 : index
    %c0_2 = arith.constant 0 : index
    %1 = vector.load %arg3[%c0_1, %c0_2] : memref<128x512xbf16, #tpu.memory_space<vmem>>, vector<128x512xbf16>
    %cst = arith.constant dense<0.000000e+00> : vector<72x512xf32>
    %2 = tpu.matmul %0, %1, %cst {dimension_numbers = #tpu.dot_dimension_numbers<[1], [0], [0], [1], [0, 0, 1, 1], [], []>} : vector<72x128xbf16>, vector<128x512xbf16>, vector<72x512xf32> -> vector<72x512xf32>
    %c0_3 = arith.constant 0 : index
    %c0_4 = arith.constant 0 : index
    %3 = vector.load %arg4[%c0_3, %c0_4] : memref<1x512xf32, #tpu.memory_space<vmem>>, vector<1x512xf32>
    %4 = vector.broadcast %3 : vector<1x512xf32> to vector<72x512xf32>
    %5 = arith.addf %2, %4 : vector<72x512xf32>
    %c0_5 = arith.constant 0 : index
    %c0_6 = arith.constant 0 : index
    %6 = vector.load %arg5[%c0_5, %c0_6] : memref<72x512xf32, #tpu.memory_space<vmem>>, vector<72x512xf32>
    tpu.vector_store %arg5[%c0_5, %c0_6], %5 {strides = array<i32>} : memref<72x512xf32, #tpu.memory_space<vmem>>, vector<72x512xf32>,
    return
  }
  func.func @transform_0(%arg0: i32, %arg1: i32) -> (i32, i32) {
    %c0_i32 = arith.constant 0 : i32
    %c0_i32_0 = arith.constant 0 : i32
    return %arg0, %c0_i32 : i32, i32
  }
  func.func @transform_1(%arg0: i32, %arg1: i32) -> (i32, i32) {
    %c0_i32 = arith.constant 0 : i32
    %c0_i32_0 = arith.constant 0 : i32
    return %c0_i32, %arg1 : i32, i32
  }
  func.func @transform_2(%arg0: i32, %arg1: i32) -> (i32, i32) {
    %c0_i32 = arith.constant 0 : i32
    %c0_i32_0 = arith.constant 0 : i32
    return %c0_i32, %arg1 : i32, i32
  }
  func.func @transform_3(%arg0: i32, %arg1: i32) -> (i32, i32) {
    %c0_i32 = arith.constant 0 : i32
    return %arg0, %arg1 : i32, i32
  }
}

</mosaic_0001>

<bundles_post_ra>
// kernel: tpu_custom_call.1
= control target key start
LH: loop header
LB: loop body
LE: loop exit
PB: predicated region body
PF: predicated region fallthrough
CT: control target
= control target key end

     0   :  { %8 = vsyncpa [#allocation3], 0  ;;  %s806_s0 = inlined_call_operand.hbm [shape: bf16[72,128], index: 0, kind: input, shape index: {}]   ;;  %s807_s1 = inlined_call_operand.hbm [shape: bf16[128,512], index: 1, kind: input, shape index: {}]   ;;  %s808_s2 = inlined_call_operand.vmem [shape: f32[1,512], index: 2, kind: input, shape index: {}]   ;;  %s809_s3 = inlined_call_operand.hbm [shape: f32[72,512], index: 3, kind: output, shape index: {}]  }
   0x1   :  { %9 = vsyncpa [#allocation6], 0 }
   0x2   :  { %10 = vsyncpa [#allocation4], 0  ;;  %s683_s12 = smov [#allocation2]   ;;  %s611_s16 = scalar_lea.hbm %s806_s0, 576 }
   0x3   :  { %s16_s13 = sshll.u32 %s683_s12, 4  ;;  %p612_p0 = scmp.ne.s32.totalorder %s806_s0, %s611_s16  ;;  %s17_s13 = int_to_ptr.vmem [resolvable:$true] %s16_s13 }
   0x4   :  { %p615_p1 = scmp.lt.u32.totalorder %s611_s16, %s806_s0 }
   0x6   :  { %p617_p2 = pnand %p615_p1, %p612_p0 }
   0x8   :  { %620 = shalt.err (!%p617_p2)
}
   0x9   :  { %s621_s21 = scalar_lea.vmem %s17_s13, 576  ;;  %p626_p4 = scmp.lt.s32.totalorder %s17_s13, %s17_s13 }
   0xa   :  { %p622_p3 = scmp.ne.s32.totalorder %s17_s13, %s621_s21  ;;  %p627_p5 = scmp.lt.s32.totalorder %s621_s21, %s621_s21 }
   0xc   :  { %p628_p6 = por %p627_p5, %p626_p4 }
   0xe   :  { %p629_p7 = pnand %p628_p6, %p622_p3 }
  0x10   :  { %632 = shalt.err (!%p629_p7)
}
  0x11   :  { %s684_s22 = smov 64   ;;  %s685_s23 = smov 4  }
  0x12   :  { %22 = dma.hbm_to_vmem [thread:$0]  %s806_s0, 576, %s17_s13, [#allocation3], %s684_s22, %s684_s22, %s685_s23  }
  0x13   :  { %s686_s26 = smov [#allocation5]   ;;  %s633_s30 = scalar_lea.hbm %s807_s1, 4096 }
  0x14   :  { %s28_s27 = sshll.u32 %s686_s26, 4  ;;  %p634_p8 = scmp.ne.s32.totalorder %s807_s1, %s633_s30  ;;  %s29_s27 = int_to_ptr.vmem [resolvable:$true] %s28_s27 }
  0x15   :  { %p637_p9 = scmp.lt.u32.totalorder %s633_s30, %s807_s1 }
  0x17   :  { %p639_p10 = pnand %p637_p9, %p634_p8 }
  0x19   :  { %642 = shalt.err (!%p639_p10)
}
  0x1a   :  { %s643_s8 = scalar_lea.vmem %s29_s27, 4096  ;;  %p648_p12 = scmp.lt.s32.totalorder %s29_s27, %s29_s27 }
  0x1b   :  { %p644_p11 = scmp.ne.s32.totalorder %s29_s27, %s643_s8  ;;  %p649_p13 = scmp.lt.s32.totalorder %s643_s8, %s643_s8 }
  0x1d   :  { %p650_p0 = por %p649_p13, %p648_p12 }
  0x1f   :  { %p651_p1 = pnand %p650_p0, %p644_p11 }
  0x21   :  { %654 = shalt.err (!%p651_p1)
}
  0x22   :  { %s687_s0 = smov 256   ;;  %s688_s9 = smov 16  }
  0x23   :  { %34 = dma.hbm_to_vmem [thread:$0]  %s807_s1, 4096, %s29_s27, [#allocation6], %s687_s0, %s687_s0, %s688_s9  }
  0x24   :  { %677 = dma.done.wait [#allocation3], 576  }
  0x25   :  { %678 = vsyncadd [#allocation3], 4294966720 }
  0x26   :  { %679 = dma.done.wait [#allocation6], 4096  }
  0x27   :  { %680 = vsyncadd [#allocation6], 4294963200  ;;  %v689_v0 = vmov 0   ;;  %v558_v1 = vld [vmem:[#allocation5 + $0x4] ss:$16 sps:$4 sm:$0xff]   ;;  %v606_v33 = vld [vmem:[#allocation2] sm:$0xff]   ;;  %v87_v38 = vlaneseq }
  0x28   :  { %327 = vmatprep.mubr.bf16.mxu0 %v689_v0  ;;  %408 = vmatprep.mubr.bf16.mxu1 %v689_v0  ;;  %v560_v2 = vld [vmem:[#allocation5 + $0xc] ss:$16 sps:$4 sm:$0xff]   ;;  %v562_v3 = vld [vmem:[#allocation5] ss:$16 sps:$4 sm:$0xff]   ;;  %v563_v4 = vld [vmem:[#allocation5 + $0x8] ss:$16 sps:$4 sm:$0xff]  }
  0x29   :  { %295 = vmatprep.subr.bf16.mxu0 %v558_v1  ;;  %376 = vmatprep.subr.bf16.mxu1 %v560_v2  ;;  %v564_v5 = vld [vmem:[#allocation5 + $0x24] ss:$16 sps:$4 sm:$0xff]   ;;  %v566_v6 = vld [vmem:[#allocation5 + $0x2c] ss:$16 sps:$4 sm:$0xff]   ;;  %v568_v7 = vld [vmem:[#allocation5 + $0x20] ss:$16 sps:$4 sm:$0xff]  }
  0x2a   :  { %296 = vmatpush1.bf16.msra.mxu0 %v562_v3  ;;  %377 = vmatpush1.bf16.msra.mxu1 %v563_v4  ;;  %v569_v8 = vld [vmem:[#allocation5 + $0x28] ss:$16 sps:$4 sm:$0xff]   ;;  %v570_v9 = vld [vmem:[#allocation5 + $0x44] ss:$16 sps:$4 sm:$0xff]   ;;  %v572_v10 = vld [vmem:[#allocation5 + $0x4c] ss:$16 sps:$4 sm:$0xff]  }
  0x2b   :  { %297 = vmatprep.subr.bf16.mxu0 %v564_v5  ;;  %378 = vmatprep.subr.bf16.mxu1 %v566_v6  ;;  %v574_v11 = vld [vmem:[#allocation5 + $0x40] ss:$16 sps:$4 sm:$0xff]   ;;  %v575_v12 = vld [vmem:[#allocation5 + $0x48] ss:$16 sps:$4 sm:$0xff]   ;;  %v576_v13 = vld [vmem:[#allocation5 + $0x64] ss:$16 sps:$4 sm:$0xff]  }
  0x2c   :  { %v578_v14 = vld [vmem:[#allocation5 + $0x6c] ss:$16 sps:$4 sm:$0xff]   ;;  %v580_v15 = vld [vmem:[#allocation5 + $0x60] ss:$16 sps:$4 sm:$0xff]   ;;  %v581_v16 = vld [vmem:[#allocation5 + $0x68] ss:$16 sps:$4 sm:$0xff]  }
  0x2d   :  { %v582_v17 = vld [vmem:[#allocation5 + $0x84] ss:$16 sps:$4 sm:$0xff]   ;;  %v584_v18 = vld [vmem:[#allocation5 + $0x8c] ss:$16 sps:$4 sm:$0xff]   ;;  %v586_v19 = vld [vmem:[#allocation5 + $0x80] ss:$16 sps:$4 sm:$0xff]  }
  0x2e   :  { %298 = vmatpush1.bf16.msra.mxu0 %v568_v7  ;;  %379 = vmatpush1.bf16.msra.mxu1 %v569_v8  ;;  %v587_v20 = vld [vmem:[#allocation5 + $0x88] ss:$16 sps:$4 sm:$0xff]   ;;  %v588_v21 = vld [vmem:[#allocation5 + $0xa4] ss:$16 sps:$4 sm:$0xff]   ;;  %v590_v22 = vld [vmem:[#allocation5 + $0xac] ss:$16 sps:$4 sm:$0xff]  }
  0x2f   :  { %299 = vmatprep.subr.bf16.mxu0 %v570_v9  ;;  %380 = vmatprep.subr.bf16.mxu1 %v572_v10  ;;  %v592_v23 = vld [vmem:[#allocation5 + $0xa0] ss:$16 sps:$4 sm:$0xff]   ;;  %v593_v24 = vld [vmem:[#allocation5 + $0xa8] ss:$16 sps:$4 sm:$0xff]   ;;  %v594_v25 = vld [vmem:[#allocation5 + $0xc4] ss:$16 sps:$4 sm:$0xff]  }
  0x30   :  { %v596_v26 = vld [vmem:[#allocation5 + $0xcc] ss:$16 sps:$4 sm:$0xff]   ;;  %v598_v27 = vld [vmem:[#allocation5 + $0xc0] ss:$16 sps:$4 sm:$0xff]   ;;  %v599_v28 = vld [vmem:[#allocation5 + $0xc8] ss:$16 sps:$4 sm:$0xff]  }
  0x31   :  { %v600_v29 = vld [vmem:[#allocation5 + $0xe4] ss:$16 sps:$4 sm:$0xff]   ;;  %v602_v30 = vld [vmem:[#allocation5 + $0xec] ss:$16 sps:$4 sm:$0xff]   ;;  %v604_v31 = vld [vmem:[#allocation5 + $0xe0] ss:$16 sps:$4 sm:$0xff]  }
  0x32   :  { %300 = vmatpush1.bf16.msra.mxu0 %v574_v11  ;;  %381 = vmatpush1.bf16.msra.mxu1 %v575_v12  ;;  %v605_v32 = vld [vmem:[#allocation5 + $0xe8] ss:$16 sps:$4 sm:$0xff]   ;;  %v608_v35 = vld [vmem:[#allocation2 + $0x10] sm:$0xff]   ;;  %v610_v37 = vld [vmem:[#allocation2 + $0x20] ss:$0 sps:$4 sm:$0xff]   ;;  %v88_v39 = vshrl.u32 %v87_v38, 7 }
  0x33   :  { %301 = vmatprep.subr.bf16.mxu0 %v576_v13  ;;  %382 = vmatprep.subr.bf16.mxu1 %v578_v14  ;;  %v607_v34 = vld [vmem:[#allocation2 + $0x8] sm:$0xff]   ;;  %v609_v36 = vld [vmem:[#allocation2 + $0x18] sm:$0xff]   ;;  %v85_v42 = vld [vmem:[%s808_s2] sm:$0xf]  ;;  %s690_s2 = smov [#allocation7]  }
  0x34   :  { %v89_v40 = vsub.s32 0, %v88_v39  ;;  %v97_v41 = vsub.s32 2, %v88_v39  ;;  %v93_v43 = vsub.s32 1, %v88_v39  ;;  %v101_v44 = vsub.s32 3, %v88_v39  ;;  %s498_s13 = sshll.u32 %s690_s2, 4  ;;  %s499_s13 = int_to_ptr.vmem [resolvable:$true] %s498_s13 }
  0x35   :  { %s655_s14 = scalar_lea.vmem %s499_s13, 4608  ;;  %p660_p3 = scmp.lt.s32.totalorder %s499_s13, %s499_s13 }
  0x36   :  { %302 = vmatpush1.bf16.msra.mxu0 %v580_v15  ;;  %383 = vmatpush1.bf16.msra.mxu1 %v581_v16  ;;  %v750_v45 = vrot.slane %v85_v42, %v89_v40  ;;  %v752_v46 = vrot.slane %v85_v42, %v97_v41  ;;  %v754_v47 = vrot.slane %v85_v42, %v93_v43  ;;  %p656_p2 = scmp.ne.s32.totalorder %s499_s13, %s655_s14  ;;  %p661_p4 = scmp.lt.s32.totalorder %s655_s14, %s655_s14 }
  0x37   :  { %303 = vmatprep.subr.bf16.mxu0 %v582_v17  ;;  %384 = vmatprep.subr.bf16.mxu1 %v584_v18  ;;  %v756_v48 = vrot.slane %v85_v42, %v101_v44 }
  0x38   :  { %p662_p5 = por %p661_p4, %p660_p3 }
  0x3a   :  { %304 = vmatpush1.bf16.msra.mxu0 %v586_v19  ;;  %385 = vmatpush1.bf16.msra.mxu1 %v587_v20  ;;  %p663_p6 = pnand %p662_p5, %p656_p2 }
  0x3b   :  { %305 = vmatprep.subr.bf16.mxu0 %v588_v21  ;;  %386 = vmatprep.subr.bf16.mxu1 %v590_v22 }
  0x3e   :  { %306 = vmatpush1.bf16.msra.mxu0 %v592_v23  ;;  %387 = vmatpush1.bf16.msra.mxu1 %v593_v24 }
  0x3f   :  { %307 = vmatprep.subr.bf16.mxu0 %v594_v25  ;;  %388 = vmatprep.subr.bf16.mxu1 %v596_v26 }
  0x42   :  { %308 = vmatpush1.bf16.msra.mxu0 %v598_v27  ;;  %389 = vmatpush1.bf16.msra.mxu1 %v599_v28 }
  0x43   :  { %309 = vmatprep.subr.bf16.mxu0 %v600_v29  ;;  %390 = vmatprep.subr.bf16.mxu1 %v602_v30 }
  0x46   :  { %310 = vmatpush1.bf16.msra.mxu0 %v604_v31  ;;  %391 = vmatpush1.bf16.msra.mxu1 %v605_v32 }
  0x49   :  { %328 = vmatmul.mubr.bf16.vlgmr.msra.gmra.mrb[0].mxu0 %v606_v33  ;;  %409 = vmatmul.mubr.bf16.vlgmr.msra.gmra.mrb[0].mxu1 %v606_v33 }
  0x4a   :  { %337 = vmatprep.mubr.bf16.mxu0 %v689_v0  ;;  %418 = vmatprep.mubr.bf16.mxu1 %v689_v0 }
  0x51   :  { %338 = vmatmul.mubr.bf16.gmra.mrb[4].mxu0 %v607_v34  ;;  %419 = vmatmul.mubr.bf16.gmra.mrb[4].mxu1 %v607_v34 }
  0x52   :  { %347 = vmatprep.mubr.bf16.mxu0 %v689_v0  ;;  %428 = vmatprep.mubr.bf16.mxu1 %v689_v0 }
  0x59   :  { %348 = vmatmul.mubr.bf16.gmra.mrb[8].mxu0 %v608_v35  ;;  %429 = vmatmul.mubr.bf16.gmra.mrb[8].mxu1 %v608_v35 }
  0x5a   :  { %357 = vmatprep.mubr.bf16.mxu0 %v689_v0  ;;  %438 = vmatprep.mubr.bf16.mxu1 %v689_v0 }
  0x61   :  { %358 = vmatmul.mubr.bf16.gmra.mrb[12].mxu0 %v609_v36  ;;  %439 = vmatmul.mubr.bf16.gmra.mrb[12].mxu1 %v609_v36 }
  0x62   :  { %367 = vmatprep.mubr.bf16.mxu0 %v689_v0  ;;  %448 = vmatprep.mubr.bf16.mxu1 %v689_v0 }
  0x69   :  { %368 = vmatmul.mubr.bf16.gmra.mrb[16].mxu0 %v610_v37  ;;  %449 = vmatmul.mubr.bf16.gmra.mrb[16].mxu1 %v610_v37 }
 0x11c   :  { %v329_v49 = vpop.f32.mrb[0].mxu0  ;;  %v410_v50 = vpop.f32.mrb[0].mxu1 }
 0x11d   :  { %v330_v51 = vadd.f32 %v329_v49, %v750_v45  ;;  %v411_v52 = vadd.f32 %v410_v50, %v752_v46  ;;  %v331_v53 = vpop.f32.mrb[1].mxu0  ;;  %v412_v54 = vpop.f32.mrb[1].mxu1 }
 0x11e   :  { %v332_v55 = vadd.f32 %v331_v53, %v754_v47  ;;  %v413_v56 = vadd.f32 %v412_v54, %v756_v48  ;;  %v333_v57 = vpop.f32.mrb[2].mxu0  ;;  %v414_v58 = vpop.f32.mrb[2].mxu1 }
 0x11f   :  { %457 = vst [vmem:[#allocation7] sm:$0xff] %v330_v51  ;;  %459 = vst [vmem:[#allocation7 + $0x10] sm:$0xff] %v411_v52  ;;  %v334_v59 = vadd.f32 %v333_v57, %v750_v45  ;;  %v415_v60 = vadd.f32 %v414_v58, %v752_v46  ;;  %v335_v61 = vpop.f32.mrb[3].mxu0  ;;  %v416_v62 = vpop.f32.mrb[3].mxu1 }
 0x120   :  { %458 = vst [vmem:[#allocation7 + $0x8] sm:$0xff] %v332_v55  ;;  %460 = vst [vmem:[#allocation7 + $0x18] sm:$0xff] %v413_v56  ;;  %v336_v63 = vadd.f32 %v335_v61, %v754_v47  ;;  %v417_v0 = vadd.f32 %v416_v62, %v756_v48 }
 0x121   :  { %461 = vst [vmem:[#allocation7 + $0x20] sm:$0xff] %v334_v59  ;;  %463 = vst [vmem:[#allocation7 + $0x30] sm:$0xff] %v415_v60 }
 0x122   :  { %462 = vst [vmem:[#allocation7 + $0x28] sm:$0xff] %v336_v63  ;;  %464 = vst [vmem:[#allocation7 + $0x38] sm:$0xff] %v417_v0 }
 0x124   :  { %v339_v1 = vpop.f32.mrb[4].mxu0  ;;  %v420_v2 = vpop.f32.mrb[4].mxu1 }
 0x125   :  { %v340_v3 = vadd.f32 %v339_v1, %v750_v45  ;;  %v421_v4 = vadd.f32 %v420_v2, %v752_v46  ;;  %v341_v5 = vpop.f32.mrb[5].mxu0  ;;  %v422_v6 = vpop.f32.mrb[5].mxu1 }
 0x126   :  { %v342_v7 = vadd.f32 %v341_v5, %v754_v47  ;;  %v423_v8 = vadd.f32 %v422_v6, %v756_v48  ;;  %v343_v9 = vpop.f32.mrb[6].mxu0  ;;  %v424_v10 = vpop.f32.mrb[6].mxu1 }
 0x127   :  { %465 = vst [vmem:[#allocation7 + $0x40] sm:$0xff] %v340_v3  ;;  %467 = vst [vmem:[#allocation7 + $0x50] sm:$0xff] %v421_v4  ;;  %v344_v11 = vadd.f32 %v343_v9, %v750_v45  ;;  %v425_v12 = vadd.f32 %v424_v10, %v752_v46  ;;  %v345_v13 = vpop.f32.mrb[7].mxu0  ;;  %v426_v14 = vpop.f32.mrb[7].mxu1 }
 0x128   :  { %466 = vst [vmem:[#allocation7 + $0x48] sm:$0xff] %v342_v7  ;;  %468 = vst [vmem:[#allocation7 + $0x58] sm:$0xff] %v423_v8  ;;  %v346_v15 = vadd.f32 %v345_v13, %v754_v47  ;;  %v427_v16 = vadd.f32 %v426_v14, %v756_v48 }
 0x129   :  { %469 = vst [vmem:[#allocation7 + $0x60] sm:$0xff] %v344_v11  ;;  %471 = vst [vmem:[#allocation7 + $0x70] sm:$0xff] %v425_v12 }
 0x12a   :  { %470 = vst [vmem:[#allocation7 + $0x68] sm:$0xff] %v346_v15  ;;  %472 = vst [vmem:[#allocation7 + $0x78] sm:$0xff] %v427_v16 }
 0x12c   :  { %v349_v17 = vpop.f32.mrb[8].mxu0  ;;  %v430_v18 = vpop.f32.mrb[8].mxu1 }
 0x12d   :  { %v350_v19 = vadd.f32 %v349_v17, %v750_v45  ;;  %v431_v20 = vadd.f32 %v430_v18, %v752_v46  ;;  %v351_v21 = vpop.f32.mrb[9].mxu0  ;;  %v432_v22 = vpop.f32.mrb[9].mxu1 }
 0x12e   :  { %v352_v23 = vadd.f32 %v351_v21, %v754_v47  ;;  %v433_v24 = vadd.f32 %v432_v22, %v756_v48  ;;  %v353_v25 = vpop.f32.mrb[10].mxu0  ;;  %v434_v26 = vpop.f32.mrb[10].mxu1 }
 0x12f   :  { %473 = vst [vmem:[#allocation7 + $0x80] sm:$0xff] %v350_v19  ;;  %475 = vst [vmem:[#allocation7 + $0x90] sm:$0xff] %v431_v20  ;;  %v354_v27 = vadd.f32 %v353_v25, %v750_v45  ;;  %v435_v28 = vadd.f32 %v434_v26, %v752_v46  ;;  %v355_v29 = vpop.f32.mrb[11].mxu0  ;;  %v436_v30 = vpop.f32.mrb[11].mxu1 }
 0x130   :  { %474 = vst [vmem:[#allocation7 + $0x88] sm:$0xff] %v352_v23  ;;  %476 = vst [vmem:[#allocation7 + $0x98] sm:$0xff] %v433_v24  ;;  %v356_v31 = vadd.f32 %v355_v29, %v754_v47  ;;  %v437_v32 = vadd.f32 %v436_v30, %v756_v48 }
 0x131   :  { %477 = vst [vmem:[#allocation7 + $0xa0] sm:$0xff] %v354_v27  ;;  %479 = vst [vmem:[#allocation7 + $0xb0] sm:$0xff] %v435_v28 }
 0x132   :  { %478 = vst [vmem:[#allocation7 + $0xa8] sm:$0xff] %v356_v31  ;;  %480 = vst [vmem:[#allocation7 + $0xb8] sm:$0xff] %v437_v32 }
 0x134   :  { %v359_v33 = vpop.f32.mrb[12].mxu0  ;;  %v440_v34 = vpop.f32.mrb[12].mxu1 }
 0x135   :  { %v360_v35 = vadd.f32 %v359_v33, %v750_v45  ;;  %v441_v36 = vadd.f32 %v440_v34, %v752_v46  ;;  %v361_v37 = vpop.f32.mrb[13].mxu0  ;;  %v442_v38 = vpop.f32.mrb[13].mxu1 }
 0x136   :  { %v362_v39 = vadd.f32 %v361_v37, %v754_v47  ;;  %v443_v40 = vadd.f32 %v442_v38, %v756_v48  ;;  %v363_v41 = vpop.f32.mrb[14].mxu0  ;;  %v444_v42 = vpop.f32.mrb[14].mxu1 }
 0x137   :  { %481 = vst [vmem:[#allocation7 + $0xc0] sm:$0xff] %v360_v35  ;;  %483 = vst [vmem:[#allocation7 + $0xd0] sm:$0xff] %v441_v36  ;;  %v364_v43 = vadd.f32 %v363_v41, %v750_v45  ;;  %v445_v44 = vadd.f32 %v444_v42, %v752_v46  ;;  %v365_v49 = vpop.f32.mrb[15].mxu0  ;;  %v446_v50 = vpop.f32.mrb[15].mxu1 }
 0x138   :  { %482 = vst [vmem:[#allocation7 + $0xc8] sm:$0xff] %v362_v39  ;;  %484 = vst [vmem:[#allocation7 + $0xd8] sm:$0xff] %v443_v40  ;;  %v366_v51 = vadd.f32 %v365_v49, %v754_v47  ;;  %v447_v52 = vadd.f32 %v446_v50, %v756_v48 }
 0x139   :  { %485 = vst [vmem:[#allocation7 + $0xe0] sm:$0xff] %v364_v43  ;;  %487 = vst [vmem:[#allocation7 + $0xf0] sm:$0xff] %v445_v44 }
 0x13a   :  { %486 = vst [vmem:[#allocation7 + $0xe8] sm:$0xff] %v366_v51  ;;  %488 = vst [vmem:[#allocation7 + $0xf8] sm:$0xff] %v447_v52 }
 0x13c   :  { %v369_v53 = vpop.f32.mrb[16].mxu0  ;;  %v450_v54 = vpop.f32.mrb[16].mxu1 }
 0x13d   :  { %v370_v55 = vadd.f32 %v369_v53, %v750_v45  ;;  %v451_v56 = vadd.f32 %v450_v54, %v752_v46  ;;  %v371_v57 = vpop.f32.mrb[17].mxu0  ;;  %v452_v58 = vpop.f32.mrb[17].mxu1 }
 0x13e   :  { %v372_v59 = vadd.f32 %v371_v57, %v754_v47  ;;  %v453_v60 = vadd.f32 %v452_v58, %v756_v48  ;;  %v373_v61 = vpop.f32.mrb[18].mxu0  ;;  %v454_v62 = vpop.f32.mrb[18].mxu1 }
 0x13f   :  { %489 = vst [vmem:[#allocation7 + $0x100] sm:$0xff] %v370_v55  ;;  %491 = vst [vmem:[#allocation7 + $0x110] sm:$0xff] %v451_v56  ;;  %v374_v63 = vpop.f32.mrb[19].mxu0  ;;  %v455_v0 = vpop.f32.mrb[19].mxu1 }
 0x140   :  { %490 = vst [vmem:[#allocation7 + $0x108] sm:$0xff] %v372_v59  ;;  %492 = vst [vmem:[#allocation7 + $0x118] sm:$0xff] %v453_v60 }
 0x141   :  { %666 = shalt.err (!%p663_p6)
}
 0x142   :  { %s667_s17 = scalar_lea.hbm %s809_s3, 4608 }
 0x143   :  { %p668_p7 = scmp.ne.s32.totalorder %s809_s3, %s667_s17  ;;  %p671_p8 = scmp.lt.u32.totalorder %s667_s17, %s809_s3 }
 0x145   :  { %p673_p9 = pnand %p671_p8, %p668_p7 }
 0x147   :  { %676 = shalt.err (!%p673_p9)
}
 0x148   :  { %s691_s22 = smov 512   ;;  %s692_s23 = smov 32  }
 0x149   :  { %504 = dma.vmem_to_hbm [thread:$0]  %s499_s13, 4608, %s809_s3, [#allocation4], %s691_s22, %s691_s22, %s692_s23  }
 0x14a   :  { %681 = dma.done.wait [#allocation4], 4608  }
 0x14b   :  { %682 = vsyncadd [#allocation4], 4294962688 }
 0x14c   :  { %508 = vsyncpa [#allocation3], 1 }
 0x14d   :  { %509 = vsyncpa [#allocation6], 1 }
 0x14e   :  { %510 = vsyncpa [#allocation4], 1 }

</bundles_post_ra>
